<compile_context>
chip_gen: v7x
topology: tpu7x:2x2x1
jax: 0.10.0
libtpu: 0.0.40
codegen_flags: <defaults>
</compile_context>

<pallas_src>
import functools

import jax
import jax.numpy as jnp
from jax.experimental import pallas as pl
from jax.experimental.pallas import tpu as pltpu

LANE = 128     # last-dim (lane) alignment (use 256 on v6e/v7x at real widths)
SUBLANE = 8    # second-to-last (sublane) alignment


def _round_up(n, m):
    return ((n + m - 1) // m) * m


def _fused_mlp_kernel(*refs):
    """refs = (x_ref, w1_ref, b1_ref, ..., wN_ref, bN_ref, o_ref, xpad_ref).

    Whole layer chain in one kernel: activations never leave VMEM / vregs.
    x arrives at its natural [B, IN] shape and is zero-padded into the
    lane/sublane-aligned VMEM scratch; each layer is then one dense
    [B_p, IN_p] @ [IN_p, OUT_p] MXU matmul (f32 accumulate) plus a broadcast
    bias add on the VPU.
    """
    x_ref, o_ref, xpad_ref = refs[0], refs[-2], refs[-1]
    b, in_f = x_ref.shape

    # Zero-fill then copy the real rows/lanes.  Padded input lanes stay
    # exactly zero and padded weight rows / bias lanes are zero, so the real
    # output lanes are numerically identical to the unpadded computation.
    xpad_ref[...] = jnp.zeros_like(xpad_ref)
    xpad_ref[0:b, 0:in_f] = x_ref[...]

    h = xpad_ref[...]
    for i in range(1, len(refs) - 2, 2):
        w_ref, b_ref = refs[i], refs[i + 1]
        h = jnp.dot(h, w_ref[...], preferred_element_type=jnp.float32) + b_ref[...]
    o_ref[...] = h.astype(o_ref.dtype)


def init_params(layer_sizes, key):
    """PyTorch nn.Linear default init: U(-1/sqrt(fan_in), 1/sqrt(fan_in)).

    Returns params in PyTorch layout: W [OUT, IN], b [OUT].
    """
    params = []
    for i in range(len(layer_sizes) - 1):
        fan_in, fan_out = layer_sizes[i], layer_sizes[i + 1]
        key, kw, kb = jax.random.split(key, 3)
        bound = float(fan_in) ** -0.5
        w = jax.random.uniform(kw, (fan_out, fan_in), jnp.float32, -bound, bound)
        b = jax.random.uniform(kb, (fan_out,), jnp.float32, -bound, bound)
        params.append((w, b))
    return params


def pack_params(params):
    """Done ONCE: pre-transpose W -> [IN, OUT] and zero-pad to lane-aligned
    shapes so the kernel does dense, unmasked MXU/VPU work every forward.
    At real sizes these would be cast to bfloat16 (f32 accumulation kept)."""
    packed = []
    for w, b in params:
        out_f, in_f = w.shape
        in_p = _round_up(in_f, LANE)
        out_p = _round_up(out_f, LANE)
        wt = jnp.zeros((in_p, out_p), jnp.float32).at[:in_f, :out_f].set(w.T)
        bp = jnp.zeros((1, out_p), jnp.float32).at[0, :out_f].set(b)
        packed.append((wt, bp))
    out_features = params[-1][0].shape[0]
    return packed, out_features


@functools.partial(jax.jit, static_argnums=(2,))
def neural_network_forward(x, packed, out_features):
    """Mirrors NeuralNetwork.forward: apply each Linear in sequence (no activation).

    x: [B, IN] f32 (natural shape — padding happens inside the kernel),
    packed: list of (W_t [IN_p, OUT_p], b [1, OUT_p]).
    """
    B, _ = x.shape
    B_p = _round_up(B, SUBLANE)
    in_p = packed[0][0].shape[0]
    out_p = packed[-1][1].shape[1]

    flat_inputs = [x]
    for wt, bp in packed:
        flat_inputs += [wt, bp]

    # Whole arrays, resident once in VMEM: no grid, no double-buffering.
    vmem_spec = pl.BlockSpec(memory_space=pltpu.MemorySpace.VMEM)

    # Explicit VMEM budget: padded footprint + headroom, capped well under
    # v7x's 64 MiB physical VMEM (also lifts v5e's ~16 MiB default limit).
    footprint = (2 * B_p * in_p + B_p * out_p) * 4
    for wt, bp in packed:
        footprint += (wt.size + _round_up(bp.shape[0], SUBLANE) * bp.shape[1]) * 4
    vmem_limit = int(min(max(2 * footprint + (8 << 20), 16 << 20), 48 << 20))

    y_pad = pl.pallas_call(
        _fused_mlp_kernel,
        out_shape=jax.ShapeDtypeStruct((B_p, out_p), x.dtype),
        in_specs=[vmem_spec] * len(flat_inputs),
        out_specs=vmem_spec,
        scratch_shapes=[pltpu.VMEM((B_p, in_p), jnp.float32)],
        compiler_params=pltpu.CompilerParams(vmem_limit_bytes=vmem_limit),
    )(*flat_inputs)

    # Slice out the true batch rows / output features (padding discarded).
    return y_pad[:B, :out_features]


if __name__ == "__main__":
    # Shapes implied by the module: input_layer=16, hidden_layers=[32, 32],
    # output_layer=8; batch of 2 input vectors.
    layer_sizes = [16, 32, 32, 8]
    batch = 2

    key = jax.random.PRNGKey(0)
    key, kx = jax.random.split(key)
    x = jax.random.normal(kx, (batch, layer_sizes[0]), jnp.float32)

    params = init_params(layer_sizes, key)          # PyTorch layout (W [OUT,IN], b [OUT])
    packed, out_features = pack_params(params)      # one-time transpose + pad

    y = neural_network_forward(x, packed, out_features)
    y = jax.block_until_ready(y)

    # Reference check in plain JAX (same semantics as PyTorch forward).
    y_ref = x
    for w, b in params:
        y_ref = y_ref @ w.T + b
    assert y.shape == (batch, layer_sizes[-1])
    assert jnp.allclose(y, y_ref, atol=1e-5, rtol=1e-5)

    print("KERNEL_OK")
</pallas_src>

<mosaic_0001>
module attributes {stable_mosaic.version = 11 : i64} {
  func.func @_fused_mlp_kernel(%arg0: memref<2x16xf32, #tpu.memory_space<vmem>>, %arg1: memref<128x128xf32, #tpu.memory_space<vmem>>, %arg2: memref<1x128xf32, #tpu.memory_space<vmem>>, %arg3: memref<128x128xf32, #tpu.memory_space<vmem>>, %arg4: memref<1x128xf32, #tpu.memory_space<vmem>>, %arg5: memref<128x128xf32, #tpu.memory_space<vmem>>, %arg6: memref<1x128xf32, #tpu.memory_space<vmem>>, %arg7: memref<8x128xf32, #tpu.memory_space<vmem>>, %arg8: memref<8x128xf32, #tpu.memory_space<vmem>>) attributes {dimension_semantics = [], scalar_prefetch = 0 : i64, scratch_operands = 1 : i64, tpu.core_type = #tpu.core_type<tc>} {
    %cst = arith.constant 0.000000e+00 : f32
    %0 = vector.broadcast %cst : f32 to vector<8x128xf32>
    %c0 = arith.constant 0 : index
    %c0_0 = arith.constant 0 : index
    %1 = vector.load %arg8[%c0, %c0_0] : memref<8x128xf32, #tpu.memory_space<vmem>>, vector<8x128xf32>
    tpu.vector_store %arg8[%c0, %c0_0], %0 {strides = array<i32>} : memref<8x128xf32, #tpu.memory_space<vmem>>, vector<8x128xf32>,
    %c0_1 = arith.constant 0 : index
    %c0_2 = arith.constant 0 : index
    %2 = vector.load %arg0[%c0_1, %c0_2] : memref<2x16xf32, #tpu.memory_space<vmem>>, vector<2x16xf32>
    %c0_3 = arith.constant 0 : index
    %c0_4 = arith.constant 0 : index
    %3 = vector.load %arg8[%c0_3, %c0_4] : memref<8x128xf32, #tpu.memory_space<vmem>>, vector<2x16xf32>
    tpu.vector_store %arg8[%c0_3, %c0_4], %2 {strides = array<i32>} : memref<8x128xf32, #tpu.memory_space<vmem>>, vector<2x16xf32>,
    %c0_5 = arith.constant 0 : index
    %c0_6 = arith.constant 0 : index
    %4 = vector.load %arg8[%c0_5, %c0_6] : memref<8x128xf32, #tpu.memory_space<vmem>>, vector<8x128xf32>
    %c0_7 = arith.constant 0 : index
    %c0_8 = arith.constant 0 : index
    %5 = vector.load %arg1[%c0_7, %c0_8] : memref<128x128xf32, #tpu.memory_space<vmem>>, vector<128x128xf32>
    %cst_9 = arith.constant dense<0.000000e+00> : vector<8x128xf32>
    %6 = tpu.matmul %4, %5, %cst_9 {dimension_numbers = #tpu.dot_dimension_numbers<[1], [0], [0], [1], [0, 0, 1, 1], [], []>} : vector<8x128xf32>, vector<128x128xf32>, vector<8x128xf32> -> vector<8x128xf32>
    %c0_10 = arith.constant 0 : index
    %c0_11 = arith.constant 0 : index
    %7 = vector.load %arg2[%c0_10, %c0_11] : memref<1x128xf32, #tpu.memory_space<vmem>>, vector<1x128xf32>
    %8 = vector.broadcast %7 : vector<1x128xf32> to vector<8x128xf32>
    %9 = arith.addf %6, %8 : vector<8x128xf32>
    %c0_12 = arith.constant 0 : index
    %c0_13 = arith.constant 0 : index
    %10 = vector.load %arg3[%c0_12, %c0_13] : memref<128x128xf32, #tpu.memory_space<vmem>>, vector<128x128xf32>
    %cst_14 = arith.constant dense<0.000000e+00> : vector<8x128xf32>
    %11 = tpu.matmul %9, %10, %cst_14 {dimension_numbers = #tpu.dot_dimension_numbers<[1], [0], [0], [1], [0, 0, 1, 1], [], []>} : vector<8x128xf32>, vector<128x128xf32>, vector<8x128xf32> -> vector<8x128xf32>
    %c0_15 = arith.constant 0 : index
    %c0_16 = arith.constant 0 : index
    %12 = vector.load %arg4[%c0_15, %c0_16] : memref<1x128xf32, #tpu.memory_space<vmem>>, vector<1x128xf32>
    %13 = vector.broadcast %12 : vector<1x128xf32> to vector<8x128xf32>
    %14 = arith.addf %11, %13 : vector<8x128xf32>
    %c0_17 = arith.constant 0 : index
    %c0_18 = arith.constant 0 : index
    %15 = vector.load %arg5[%c0_17, %c0_18] : memref<128x128xf32, #tpu.memory_space<vmem>>, vector<128x128xf32>
    %cst_19 = arith.constant dense<0.000000e+00> : vector<8x128xf32>
    %16 = tpu.matmul %14, %15, %cst_19 {dimension_numbers = #tpu.dot_dimension_numbers<[1], [0], [0], [1], [0, 0, 1, 1], [], []>} : vector<8x128xf32>, vector<128x128xf32>, vector<8x128xf32> -> vector<8x128xf32>
    %c0_20 = arith.constant 0 : index
    %c0_21 = arith.constant 0 : index
    %17 = vector.load %arg6[%c0_20, %c0_21] : memref<1x128xf32, #tpu.memory_space<vmem>>, vector<1x128xf32>
    %18 = vector.broadcast %17 : vector<1x128xf32> to vector<8x128xf32>
    %19 = arith.addf %16, %18 : vector<8x128xf32>
    %c0_22 = arith.constant 0 : index
    %c0_23 = arith.constant 0 : index
    %20 = vector.load %arg7[%c0_22, %c0_23] : memref<8x128xf32, #tpu.memory_space<vmem>>, vector<8x128xf32>
    tpu.vector_store %arg7[%c0_22, %c0_23], %19 {strides = array<i32>} : memref<8x128xf32, #tpu.memory_space<vmem>>, vector<8x128xf32>,
    return
  }
}

</mosaic_0001>

<bundles_post_ra>
// kernel: neural_network_forward.1
= control target key start
LH: loop header
LB: loop body
LE: loop exit
PB: predicated region body
PF: predicated region fallthrough
CT: control target
= control target key end

     0   :  { %12 = vsyncpa [#allocation4], 0  ;;  %s854_s0 = inlined_call_operand.hbm [shape: f32[2,16], index: 0, kind: input, shape index: {}]   ;;  %s855_s1 = inlined_call_operand.hbm [shape: f32[128,128], index: 1, kind: input, shape index: {}]   ;;  %s856_s2 = inlined_call_operand.vmem [shape: f32[1,128], index: 2, kind: input, shape index: {}]   ;;  %s857_s3 = inlined_call_operand.hbm [shape: f32[128,128], index: 3, kind: input, shape index: {}]   ;;  %s858_s4 = inlined_call_operand.vmem [shape: f32[1,128], index: 4, kind: input, shape index: {}]   ;;  %s859_s5 = inlined_call_operand.hbm [shape: f32[128,128], index: 5, kind: input, shape index: {}]   ;;  %s860_s6 = inlined_call_operand.vmem [shape: f32[1,128], index: 6, kind: input, shape index: {}]   ;;  %s861_s7 = inlined_call_operand.vmem [shape: f32[8,128], index: 7, kind: output, shape index: {}]  }
   0x1   :  { %13 = vsyncpa [#allocation6], 0 }
   0x2   :  { %14 = vsyncpa [#allocation9], 0  ;;  %s705_s24 = smov [#allocation5]   ;;  %s611_s28 = scalar_lea.hbm %s855_s1, 2048 }
   0x3   :  { %s30_s25 = sshll.u32 %s705_s24, 4  ;;  %p612_p0 = scmp.ne.s32.totalorder %s855_s1, %s611_s28  ;;  %s31_s25 = int_to_ptr.vmem [resolvable:$true] %s30_s25 }
   0x4   :  { %p615_p1 = scmp.lt.u32.totalorder %s611_s28, %s855_s1 }
   0x6   :  { %p617_p2 = pnand %p615_p1, %p612_p0 }
   0x8   :  { %620 = shalt.err (!%p617_p2)
}
   0x9   :  { %s621_s10 = scalar_lea.vmem %s31_s25, 2048  ;;  %p626_p4 = scmp.lt.s32.totalorder %s31_s25, %s31_s25 }
   0xa   :  { %p622_p3 = scmp.ne.s32.totalorder %s31_s25, %s621_s10  ;;  %p627_p5 = scmp.lt.s32.totalorder %s621_s10, %s621_s10 }
   0xc   :  { %p628_p6 = por %p627_p5, %p626_p4 }
   0xe   :  { %p629_p7 = pnand %p628_p6, %p622_p3 }
  0x10   :  { %632 = shalt.err (!%p629_p7)
}
  0x11   :  { %s706_s11 = smov 128   ;;  %s707_s12 = smov 8  }
  0x12   :  { %36 = dma.hbm_to_vmem [thread:$0]  %s855_s1, 2048, %s31_s25, [#allocation6], %s706_s11, %s706_s11, %s707_s12  }
  0x13   :  { %s708_s15 = smov [#allocation3]   ;;  %s709_s17 = smov [#allocation7]  }
  0x14   :  { %s21_s16 = sshll.u32 %s708_s15, 4  ;;  %s44_s18 = sshll.u32 %s709_s17, 4  ;;  %s22_s16 = int_to_ptr.vmem [resolvable:$true] %s21_s16  ;;  %s45_s18 = int_to_ptr.vmem [resolvable:$true] %s44_s18 }
  0x15   :  { %s633_s21 = scalar_lea.hbm %s854_s0, 32 }
  0x16   :  { %p634_p8 = scmp.ne.s32.totalorder %s854_s0, %s633_s21  ;;  %p637_p9 = scmp.lt.u32.totalorder %s633_s21, %s854_s0 }
  0x18   :  { %p639_p10 = pnand %p637_p9, %p634_p8 }
  0x1a   :  { %642 = shalt.err (!%p639_p10)
}
  0x1b   :  { %s643_s1 = scalar_lea.vmem %s22_s16, 32  ;;  %p648_p12 = scmp.lt.s32.totalorder %s22_s16, %s22_s16 }
  0x1c   :  { %p644_p11 = scmp.ne.s32.totalorder %s22_s16, %s643_s1  ;;  %p649_p13 = scmp.lt.s32.totalorder %s643_s1, %s643_s1 }
  0x1e   :  { %p650_p0 = por %p649_p13, %p648_p12 }
  0x20   :  { %p651_p1 = pnand %p650_p0, %p644_p11 }
  0x22   :  { %654 = shalt.err (!%p651_p1)
}
  0x23   :  { %24 = dma.hbm_to_vmem [thread:$0]  %s854_s0, 32, %s22_s16, [#allocation4]  }
  0x24   :  { %s655_s30 = scalar_lea.hbm %s857_s3, 2048 }
  0x25   :  { %p656_p2 = scmp.ne.s32.totalorder %s857_s3, %s655_s30  ;;  %p659_p3 = scmp.lt.u32.totalorder %s655_s30, %s857_s3 }
  0x27   :  { %p661_p4 = pnand %p659_p3, %p656_p2 }
  0x29   :  { %664 = shalt.err (!%p661_p4)
}
  0x2a   :  { %s665_s14 = scalar_lea.vmem %s45_s18, 2048  ;;  %p670_p6 = scmp.lt.s32.totalorder %s45_s18, %s45_s18 }
  0x2b   :  { %p666_p5 = scmp.ne.s32.totalorder %s45_s18, %s665_s14  ;;  %p671_p7 = scmp.lt.s32.totalorder %s665_s14, %s665_s14 }
  0x2d   :  { %p672_p8 = por %p671_p7, %p670_p6 }
  0x2f   :  { %p673_p9 = pnand %p672_p8, %p666_p5 }
  0x31   :  { %676 = shalt.err (!%p673_p9)
}
  0x32   :  { %50 = dma.hbm_to_vmem [thread:$0]  %s857_s3, 2048, %s45_s18, [#allocation6], %s706_s11, %s706_s11, %s707_s12  }
  0x33   :  { %s710_s16 = smov [#allocation8]   ;;  %s677_s21 = scalar_lea.hbm %s859_s5, 2048 }
  0x34   :  { %s58_s17 = sshll.u32 %s710_s16, 4  ;;  %p678_p10 = scmp.ne.s32.totalorder %s859_s5, %s677_s21  ;;  %s59_s17 = int_to_ptr.vmem [resolvable:$true] %s58_s17 }
  0x35   :  { %p681_p11 = scmp.lt.u32.totalorder %s677_s21, %s859_s5 }
  0x37   :  { %p683_p12 = pnand %p681_p11, %p678_p10 }
  0x39   :  { %686 = shalt.err (!%p683_p12)
}
  0x3a   :  { %s687_s1 = scalar_lea.vmem %s59_s17, 2048  ;;  %p692_p0 = scmp.lt.s32.totalorder %s59_s17, %s59_s17 }
  0x3b   :  { %p688_p13 = scmp.ne.s32.totalorder %s59_s17, %s687_s1  ;;  %p693_p1 = scmp.lt.s32.totalorder %s687_s1, %s687_s1 }
  0x3d   :  { %p694_p2 = por %p693_p1, %p692_p0 }
  0x3f   :  { %p695_p3 = pnand %p694_p2, %p688_p13 }
  0x41   :  { %698 = shalt.err (!%p695_p3)
}
  0x42   :  { %64 = dma.hbm_to_vmem [thread:$0]  %s859_s5, 2048, %s59_s17, [#allocation9], %s706_s11, %s706_s11, %s707_s12  }
  0x43   :  { %699 = dma.done.wait [#allocation4], 32  }
  0x44   :  { %700 = vsyncadd [#allocation4], 4294967264 }
  0x45   :  { %701 = dma.done.wait [#allocation6], 4096  }
  0x46   :  { %702 = vsyncadd [#allocation6], 4294963200 }
  0x47   :  { %703 = dma.done.wait [#allocation9], 2048  }
  0x48   :  { %704 = vsyncadd [#allocation9], 4294965248  ;;  %v711_v0 = vmov 0.0|0.0   ;;  %v712_v1 = vmov 0.0   ;;  %vm713_vm0 = vmmov 0   ;;  %v84_v2 = vld [vmem:[#allocation5] sm:$0xff] }
  0x49   :  { %530 = vmatprep.subr.bf16.mxu0 %v711_v0  ;;  %79 = vst [vmem:[#allocation2] sm:$0xff] %v712_v1  ;;  %457 = vmatprep.mubr.msk.f32.mxu0 %vm713_vm0, %v712_v1  ;;  %v85_v3 = vld [vmem:[#allocation5 + $0x8] sm:$0xff]  ;;  %v86_v4 = vld [vmem:[#allocation5 + $0x10] sm:$0xff]  ;;  %v87_v6 = vld [vmem:[#allocation5 + $0x18] sm:$0xff]  ;;  %vm81_vm1 = vcmask 123904  }
  0x4a   :  { %554 = vmatprep.subr.bf16.mxu1 %v711_v0  ;;  %492 = vmatprep.mubr.msk.f32.mxu1 %vm713_vm0, %v712_v1  ;;  %v531_v5 = vpack.c.bf16 %v85_v3, %v84_v2  ;;  %v534_v7 = vpack.c.bf16 %v87_v6, %v86_v4  ;;  %v88_v8 = vld [vmem:[#allocation5 + $0x20] sm:$0xff]  ;;  %v89_v9 = vld [vmem:[#allocation5 + $0x28] sm:$0xff]  ;;  %v80_v10 = vld [vmem:[#allocation3] sm:$0x3] }
  0x4b   :  { %v177_v11 = vld [vmem:[#allocation7] sm:$0xff]  ;;  %82 = vst.msk [vmem:[#allocation2] sm:$0x3] %vm81_vm1, %v80_v10  ;;  %v178_v12 = vld [vmem:[#allocation7 + $0x8] sm:$0xff]  ;;  %v179_v13 = vld [vmem:[#allocation7 + $0x10] sm:$0xff]  ;;  %v537_v15 = vpack.c.bf16 %v89_v9, %v88_v8 }
  0x4c   :  { %532 = vmatpush3.bf16.msra.mxu0 %v531_v5  ;;  %v180_v14 = vld [vmem:[#allocation7 + $0x18] sm:$0xff]  ;;  %v555_v16 = vpack.c.bf16 %v178_v12, %v177_v11  ;;  %v90_v17 = vld [vmem:[#allocation5 + $0x30] sm:$0xff]  ;;  %v181_v20 = vld [vmem:[#allocation7 + $0x20] sm:$0xff] }
  0x4d   :  { %533 = vmatprep.subr.bf16.mxu0 %v711_v0  ;;  %v91_v18 = vld [vmem:[#allocation5 + $0x38] sm:$0xff]  ;;  %v558_v19 = vpack.c.bf16 %v180_v14, %v179_v13  ;;  %v182_v21 = vld [vmem:[#allocation7 + $0x28] sm:$0xff]  ;;  %v92_v23 = vld [vmem:[#allocation5 + $0x40] sm:$0xff] }
  0x4e   :  { %556 = vmatpush3.bf16.msra.mxu1 %v555_v16  ;;  %v540_v22 = vpack.c.bf16 %v91_v18, %v90_v17  ;;  %v93_v24 = vld [vmem:[#allocation5 + $0x48] sm:$0xff]  ;;  %v561_v25 = vpack.c.bf16 %v182_v21, %v181_v20  ;;  %v183_v26 = vld [vmem:[#allocation7 + $0x30] sm:$0xff]  ;;  %v184_v27 = vld [vmem:[#allocation7 + $0x38] sm:$0xff] }
  0x4f   :  { %557 = vmatprep.subr.bf16.mxu1 %v711_v0  ;;  %v543_v28 = vpack.c.bf16 %v93_v24, %v92_v23  ;;  %v94_v29 = vld [vmem:[#allocation5 + $0x50] sm:$0xff]  ;;  %v95_v30 = vld [vmem:[#allocation5 + $0x58] sm:$0xff]  ;;  %v564_v31 = vpack.c.bf16 %v184_v27, %v183_v26  ;;  %v185_v32 = vld [vmem:[#allocation7 + $0x40] sm:$0xff] }
  0x50   :  { %535 = vmatpush3.bf16.msra.mxu0 %v534_v7  ;;  %v186_v33 = vld [vmem:[#allocation7 + $0x48] sm:$0xff]  ;;  %v546_v34 = vpack.c.bf16 %v95_v30, %v94_v29  ;;  %v96_v35 = vld [vmem:[#allocation5 + $0x60] sm:$0xff]  ;;  %v187_v38 = vld [vmem:[#allocation7 + $0x50] sm:$0xff] }
  0x51   :  { %536 = vmatprep.subr.bf16.mxu0 %v711_v0  ;;  %v97_v36 = vld [vmem:[#allocation5 + $0x68] sm:$0xff]  ;;  %v567_v37 = vpack.c.bf16 %v186_v33, %v185_v32  ;;  %v188_v39 = vld [vmem:[#allocation7 + $0x58] sm:$0xff]  ;;  %v98_v41 = vld [vmem:[#allocation5 + $0x70] sm:$0xff] }
  0x52   :  { %559 = vmatpush3.bf16.msra.mxu1 %v558_v19  ;;  %v549_v40 = vpack.c.bf16 %v97_v36, %v96_v35  ;;  %v99_v42 = vld [vmem:[#allocation5 + $0x78] sm:$0xff]  ;;  %v570_v43 = vpack.c.bf16 %v188_v39, %v187_v38  ;;  %v189_v44 = vld [vmem:[#allocation7 + $0x60] sm:$0xff]  ;;  %v190_v45 = vld [vmem:[#allocation7 + $0x68] sm:$0xff] }
  0x53   :  { %560 = vmatprep.subr.bf16.mxu1 %v711_v0  ;;  %v552_v46 = vpack.c.bf16 %v99_v42, %v98_v41  ;;  %v573_v47 = vpack.c.bf16 %v190_v45, %v189_v44  ;;  %v83_v48 = vld [vmem:[#allocation2] sm:$0xff]  ;;  %v270_v52 = vld [vmem:[#allocation8] sm:$0xff]  ;;  %v271_v53 = vld [vmem:[#allocation8 + $0x8] sm:$0xff] }
  0x54   :  { %538 = vmatpush3.bf16.msra.mxu0 %v537_v15  ;;  %v191_v49 = vld [vmem:[#allocation7 + $0x70] sm:$0xff]  ;;  %v192_v50 = vld [vmem:[#allocation7 + $0x78] sm:$0xff]  ;;  %v579_v55 = vpack.c.bf16 %v271_v53, %v270_v52  ;;  %v274_v58 = vld [vmem:[#allocation8 + $0x20] sm:$0xff] }
  0x55   :  { %539 = vmatprep.subr.bf16.mxu0 %v711_v0  ;;  %v576_v51 = vpack.c.bf16 %v192_v50, %v191_v49  ;;  %v272_v54 = vld [vmem:[#allocation8 + $0x10] sm:$0xff]  ;;  %v273_v56 = vld [vmem:[#allocation8 + $0x18] sm:$0xff]  ;;  %v275_v59 = vld [vmem:[#allocation8 + $0x28] sm:$0xff] }
  0x56   :  { %562 = vmatpush3.bf16.msra.mxu1 %v561_v25  ;;  %v582_v57 = vpack.c.bf16 %v273_v56, %v272_v54  ;;  %v585_v60 = vpack.c.bf16 %v275_v59, %v274_v58  ;;  %v276_v61 = vld [vmem:[#allocation8 + $0x30] sm:$0xff]  ;;  %v277_v62 = vld [vmem:[#allocation8 + $0x38] sm:$0xff]  ;;  %v279_v2 = vld [vmem:[#allocation8 + $0x48] sm:$0xff] }
  0x57   :  { %563 = vmatprep.subr.bf16.mxu1 %v711_v0  ;;  %v588_v63 = vpack.c.bf16 %v277_v62, %v276_v61  ;;  %v280_v4 = vld [vmem:[#allocation8 + $0x50] sm:$0xff]  ;;  %v281_v5 = vld [vmem:[#allocation8 + $0x58] sm:$0xff]  ;;  %v282_v7 = vld [vmem:[#allocation8 + $0x60] sm:$0xff] }
  0x58   :  { %541 = vmatpush3.bf16.msra.mxu0 %v540_v22  ;;  %v594_v6 = vpack.c.bf16 %v281_v5, %v280_v4  ;;  %v283_v8 = vld [vmem:[#allocation8 + $0x68] sm:$0xff]  ;;  %v371_v10 = vld [vmem:[%s856_s2] ss:$0 sm:$0xff]  ;;  %v285_v15 = vld [vmem:[#allocation8 + $0x78] sm:$0xff] }
  0x59   :  { %542 = vmatprep.subr.bf16.mxu0 %v711_v0  ;;  %v597_v9 = vpack.c.bf16 %v283_v8, %v282_v7  ;;  %v284_v14 = vld [vmem:[#allocation8 + $0x70] sm:$0xff] }
  0x5a   :  { %565 = vmatpush3.bf16.msra.mxu1 %v564_v31  ;;  %v600_v16 = vpack.c.bf16 %v285_v15, %v284_v14  ;;  %v372_v17 = vld [vmem:[%s858_s4] ss:$0 sm:$0xff] }
  0x5b   :  { %566 = vmatprep.subr.bf16.mxu1 %v711_v0 }
  0x5c   :  { %544 = vmatpush3.bf16.msra.mxu0 %v543_v28 }
  0x5d   :  { %545 = vmatprep.subr.bf16.mxu0 %v711_v0 }
  0x5e   :  { %568 = vmatpush3.bf16.msra.mxu1 %v567_v37 }
  0x5f   :  { %569 = vmatprep.subr.bf16.mxu1 %v711_v0 }
  0x60   :  { %547 = vmatpush3.bf16.msra.mxu0 %v546_v34 }
  0x61   :  { %548 = vmatprep.subr.bf16.mxu0 %v711_v0 }
  0x62   :  { %571 = vmatpush3.bf16.msra.mxu1 %v570_v43 }
  0x63   :  { %572 = vmatprep.subr.bf16.mxu1 %v711_v0 }
  0x64   :  { %550 = vmatpush3.bf16.msra.mxu0 %v549_v40 }
  0x65   :  { %551 = vmatprep.subr.bf16.mxu0 %v711_v0 }
  0x66   :  { %574 = vmatpush3.bf16.msra.mxu1 %v573_v47 }
  0x67   :  { %575 = vmatprep.subr.bf16.mxu1 %v711_v0 }
  0x68   :  { %553 = vmatpush3.bf16.msra.mxu0 %v552_v46 }
  0x69   :  { %578 = vmatprep.subr.bf16.mxu0 %v711_v0 }
  0x6a   :  { %577 = vmatpush3.bf16.msra.mxu1 %v576_v51 }
  0x6b   :  { %458 = vmatmul.mubr.f32.vlgmr.msra.gmra.mrb[0].mxu0 %v83_v48 }
  0x6c   :  { %527 = vmatprep.mubr.msk.f32.mxu0 %vm713_vm0, %v712_v1  ;;  %580 = vmatpush3.bf16.msra.mxu0 %v579_v55  ;;  %v278_v1 = vld [vmem:[#allocation8 + $0x40] sm:$0xff] }
  0x6d   :  { %581 = vmatprep.subr.bf16.mxu0 %v711_v0  ;;  %v591_v3 = vpack.c.bf16 %v279_v2, %v278_v1 }
  0x70   :  { %583 = vmatpush3.bf16.msra.mxu0 %v582_v57 }
  0x71   :  { %584 = vmatprep.subr.bf16.mxu0 %v711_v0 }
  0x74   :  { %586 = vmatpush3.bf16.msra.mxu0 %v585_v60 }
  0x75   :  { %587 = vmatprep.subr.bf16.mxu0 %v711_v0 }
  0x78   :  { %589 = vmatpush3.bf16.msra.mxu0 %v588_v63 }
  0x79   :  { %590 = vmatprep.subr.bf16.mxu0 %v711_v0 }
  0x7c   :  { %592 = vmatpush3.bf16.msra.mxu0 %v591_v3 }
  0x7d   :  { %593 = vmatprep.subr.bf16.mxu0 %v711_v0 }
  0x80   :  { %595 = vmatpush3.bf16.msra.mxu0 %v594_v6 }
  0x81   :  { %596 = vmatprep.subr.bf16.mxu0 %v711_v0 }
  0x84   :  { %598 = vmatpush3.bf16.msra.mxu0 %v597_v9 }
  0x85   :  { %599 = vmatprep.subr.bf16.mxu0 %v711_v0  ;;  %v373_v0 = vld [vmem:[%s860_s6] ss:$0 sm:$0xff] }
  0x88   :  { %601 = vmatpush3.bf16.msra.mxu0 %v600_v16 }
 0x13e   :  { %v173_v11 = vpop.f32.mrb[0].mxu0 }
 0x13f   :  { %v174_v12 = vadd.f32 %v371_v10, %v173_v11  ;;  %v459_v13 = vpop.f32.mrb[1].mxu0 }
 0x141   :  { %493 = vmatmul.mubr.f32.vlgmr.msra.gmra.mrb[0].mxu1 %v174_v12 }
 0x214   :  { %v266_v18 = vpop.f32.mrb[0].mxu1 }
 0x215   :  { %v267_v19 = vadd.f32 %v372_v17, %v266_v18  ;;  %v494_v20 = vpop.f32.mrb[1].mxu1 }
 0x217   :  { %528 = vmatmul.mubr.f32.vlgmr.msra.gmra.mrb[2].mxu0 %v267_v19 }
 0x2ea   :  { %v359_v21 = vpop.f32.mrb[2].mxu0 }
 0x2eb   :  { %v360_v22 = vadd.f32 %v373_v0, %v359_v21  ;;  %v529_v23 = vpop.f32.mrb[3].mxu0 }
 0x2ed   :  { %363 = vst [vmem:[%s861_s7] sm:$0xff] %v360_v22 }
 0x2ee   :  { %368 = vsyncpa [#allocation4], 1 }
 0x2ef   :  { %369 = vsyncpa [#allocation6], 1 }
 0x2f0   :  { %370 = vsyncpa [#allocation9], 1 }

</bundles_post_ra>
